<compile_context>
chip_gen: v7x
topology: tpu7x:2x2x1
jax: 0.10.0
libtpu: 0.0.40
codegen_flags: <defaults>
</compile_context>

<pallas_src>
import math
from functools import partial

import jax
import jax.numpy as jnp
from jax import lax
from jax.experimental import pallas as pl
from jax.experimental.pallas import tpu as pltpu

NEG_INF = -1e30  # finite stand-in for float('-inf') in the causal mask (exp -> 0)


# ------------------------------ device budgets -------------------------------

_VMEM_LIMIT = None


def _vmem_limit_bytes():
    """Device-derived scoped-VMEM budget (v5e/v6e: 128 MiB phys, v7x: 64 MiB)."""
    global _VMEM_LIMIT
    if _VMEM_LIMIT is None:
        cap = 128 * 1024 * 1024
        try:
            cap = int(getattr(pltpu.get_tpu_info(), "vmem_capacity_bytes", cap))
        except Exception:
            pass
        _VMEM_LIMIT = int(min(cap * 0.45, 100 * 1024 * 1024))
    return _VMEM_LIMIT


def _round_up(x, m):
    return (x + m - 1) // m * m


def _pick_tile(dim, pref, align):
    """Largest power-of-two tile <= pref, >= align, dividing dim; else full dim."""
    t = pref
    while t >= align:
        if dim % t == 0:
            return t
        t //= 2
    return dim


def _pick_heads(H, S, Dh, budget_bytes):
    """Heads per attention grid step.

    Budgets double-buffered bf16 q/k/v/out blocks PLUS fp32 score/prob
    temporaries.  hsub must be a multiple of 8 or equal to H (block-layout rule
    on the second-to-last block dim)."""
    per_head = (3 * 2 * 2 * S * Dh      # q/k/v blocks, bf16, double-buffered
                + 3 * 4 * S * S         # s / p / exp temporaries, fp32
                + 2 * 2 * S * Dh)       # out block, bf16, double-buffered
    legal = [h for h in range(H, 0, -1) if H % h == 0 and (h == H or h % 8 == 0)]
    for h in legal:
        if h * per_head <= budget_bytes:
            return h
    return legal[-1]


# ----------------------------- linear (matmul) -------------------------------

def _linear_kernel(*refs, activation, fuse_ln, add_residual):
    """Tiled matmul with optional fused LayerNorm (cached per row-block), bias,
    QuickGELU and residual add on the finalize step."""
    idx = 0
    if fuse_ln:
        ln_g_ref, ln_b_ref = refs[idx], refs[idx + 1]
        idx += 2
    x_ref, w_ref, b_ref = refs[idx], refs[idx + 1], refs[idx + 2]
    idx += 3
    if add_residual:
        r_ref = refs[idx]
        idx += 1
    o_ref = refs[idx]
    acc_ref = refs[idx + 1]
    if fuse_ln:
        xn_ref = refs[idx + 2]            # (tm, K) normalized-x cache (bf16)

    j = pl.program_id(1)
    k = pl.program_id(2)

    @pl.when(k == 0)
    def _():
        acc_ref[...] = jnp.zeros_like(acc_ref)

    if fuse_ln:
        # LN needs the full K row -> K grid is 1; compute LN only for the first
        # output-column tile of this row block and reuse the cached result.
        @pl.when(j == 0)
        def _():
            xf = x_ref[...].astype(jnp.float32)
            mu = jnp.mean(xf, axis=-1, keepdims=True)
            var = jnp.mean(jnp.square(xf - mu), axis=-1, keepdims=True)
            xf = (xf - mu) * lax.rsqrt(var + 1e-5)
            xn_ref[...] = (xf * ln_g_ref[...].astype(jnp.float32)
                           + ln_b_ref[...].astype(jnp.float32)).astype(xn_ref.dtype)
        x = xn_ref[...]
    else:
        x = x_ref[...]

    acc_ref[...] += jnp.dot(x, w_ref[...], preferred_element_type=jnp.float32)

    @pl.when(k == pl.num_programs(2) - 1)
    def _():
        y = acc_ref[...] + b_ref[...].astype(jnp.float32)
        if activation == "quick_gelu":      # CLIP QuickGELU: x * sigmoid(1.702 x)
            y = y * jax.nn.sigmoid(1.702 * y)
        if add_residual:
            y = y + r_ref[...].astype(jnp.float32)
        o_ref[...] = y.astype(o_ref.dtype)


def pallas_linear(x, w, b=None, *, activation=None, residual=None, ln=None,
                  tm_pref=256, tn_pref=256, tk_pref=512):
    """y = [opt LN](x) @ w + b [opt QuickGELU] [opt + residual].

    x: [M, K] (bf16), w: [K, N] (bf16, pre-transposed), b: [N] or None.
    """
    M, K = x.shape
    Kw, N = w.shape
    assert Kw == K
    if b is None:
        b = jnp.zeros((N,), x.dtype)
    b2 = b.reshape(1, N)

    fuse_ln = ln is not None
    add_res = residual is not None

    # --- M tiling: pad large ragged M (e.g. B*257) instead of degenerating. ---
    if M > tm_pref:
        tm = tm_pref
        Mp = _round_up(M, tm)
    else:
        tm = M
        Mp = M
    if Mp != M:
        x = jnp.pad(x, ((0, Mp - M), (0, 0)))
        if add_res:
            residual = jnp.pad(residual, ((0, Mp - M), (0, 0)))

    tn = _pick_tile(N, tn_pref, 128)
    tk = K if fuse_ln else _pick_tile(K, tk_pref, 128)   # LN needs the full row
    grid = (Mp // tm, N // tn, K // tk)

    in_specs = []
    inputs = []
    if fuse_ln:
        g, bb = ln
        in_specs += [pl.BlockSpec((1, K), lambda i, j, k: (0, 0)),
                     pl.BlockSpec((1, K), lambda i, j, k: (0, 0))]
        inputs += [g.reshape(1, K), bb.reshape(1, K)]
    in_specs += [pl.BlockSpec((tm, tk), lambda i, j, k: (i, k)),
                 pl.BlockSpec((tk, tn), lambda i, j, k: (k, j)),
                 pl.BlockSpec((1, tn), lambda i, j, k: (0, j))]
    inputs += [x, w, b2]
    if add_res:
        in_specs.append(pl.BlockSpec((tm, tn), lambda i, j, k: (i, j)))
        inputs.append(residual)

    scratch = [pltpu.VMEM((tm, tn), jnp.float32)]
    if fuse_ln:
        scratch.append(pltpu.VMEM((tm, K), x.dtype))
        # j must run sequentially per row block so the LN cache is valid.
        dims = ("parallel", "arbitrary", "arbitrary")
    else:
        dims = ("parallel", "parallel", "arbitrary")

    out = pl.pallas_call(
        partial(_linear_kernel, activation=activation,
                fuse_ln=fuse_ln, add_residual=add_res),
        out_shape=jax.ShapeDtypeStruct((Mp, N), x.dtype),
        grid=grid,
        in_specs=in_specs,
        out_specs=pl.BlockSpec((tm, tn), lambda i, j, k: (i, j)),
        scratch_shapes=scratch,
        compiler_params=pltpu.CompilerParams(
            dimension_semantics=dims,
            vmem_limit_bytes=_vmem_limit_bytes()),
    )(*inputs)
    return out[:M] if Mp != M else out


# ----------------------- LayerNorm (+ fused add) ------------------------------

def _ln_add_kernel(x_ref, add_ref, g_ref, b_ref, o_ref):
    x = x_ref[...].astype(jnp.float32) + add_ref[...].astype(jnp.float32)
    mu = jnp.mean(x, axis=-1, keepdims=True)
    var = jnp.mean(jnp.square(x - mu), axis=-1, keepdims=True)
    y = (x - mu) * lax.rsqrt(var + 1e-5)
    o_ref[...] = (y * g_ref[...].astype(jnp.float32)
                  + b_ref[...].astype(jnp.float32)).astype(o_ref.dtype)


def pallas_layernorm_add(x, add, g, b):
    """LayerNorm(x + add) over the last dim.  x: [B, S, W], add: [S, W]."""
    B, S, W = x.shape
    return pl.pallas_call(
        _ln_add_kernel,
        out_shape=jax.ShapeDtypeStruct((B, S, W), x.dtype),
        grid=(B,),
        in_specs=[pl.BlockSpec((None, S, W), lambda i: (i, 0, 0)),
                  pl.BlockSpec((S, W), lambda i: (0, 0)),
                  pl.BlockSpec((1, W), lambda i: (0, 0)),
                  pl.BlockSpec((1, W), lambda i: (0, 0))],
        out_specs=pl.BlockSpec((None, S, W), lambda i: (i, 0, 0)),
        compiler_params=pltpu.CompilerParams(
            dimension_semantics=("parallel",),
            vmem_limit_bytes=_vmem_limit_bytes()),
    )(x, add, g.reshape(1, W), b.reshape(1, W))


# ------------------------------- attention -----------------------------------

def _attention_kernel(q_ref, k_ref, v_ref, o_ref, *, scale, causal):
    """q/k/v refs: (S, hsub, Dh) bf16 carved straight out of the packed QKV.
    Softmax stats in fp32; per-head 2-D matmuls keep MXU lowering simple."""
    S, hsub, Dh = q_ref.shape
    if causal:
        rows = lax.broadcasted_iota(jnp.int32, (S, S), 0)
        cols = lax.broadcasted_iota(jnp.int32, (S, S), 1)
        masked = cols > rows                      # strictly-upper = future tokens
    for h in range(hsub):                          # static unroll, hsub is small
        q = q_ref[:, h, :]
        k = k_ref[:, h, :]
        v = v_ref[:, h, :]
        s = lax.dot_general(q, k, (((1,), (1,)), ((), ())),
                            preferred_element_type=jnp.float32) * scale
        if causal:
            s = jnp.where(masked, NEG_INF, s)
        s = s - jnp.max(s, axis=-1, keepdims=True)
        p = jnp.exp(s)
        p = p * pl.reciprocal(jnp.sum(p, axis=-1, keepdims=True), approx=True)
        o = jnp.dot(p.astype(v.dtype), v, preferred_element_type=jnp.float32)
        o_ref[:, h, :] = o.astype(o_ref.dtype)


def pallas_attention(qkv, *, causal):
    """qkv: [B, S, 3, H, Dh] packed projection -> [B, S, H, Dh]."""
    B, S, three, H, Dh = qkv.shape
    assert three == 3
    scale = 1.0 / math.sqrt(Dh)
    hsub = _pick_heads(H, S, Dh, _vmem_limit_bytes() // 2)
    grid = (B, H // hsub)

    qkv_spec = lambda part: pl.BlockSpec(
        (None, S, None, hsub, Dh), lambda b, h, _p=part: (b, 0, _p, h, 0))

    return pl.pallas_call(
        partial(_attention_kernel, scale=scale, causal=causal),
        out_shape=jax.ShapeDtypeStruct((B, S, H, Dh), qkv.dtype),
        grid=grid,
        in_specs=[qkv_spec(0), qkv_spec(1), qkv_spec(2)],
        out_specs=pl.BlockSpec((None, S, hsub, Dh), lambda b, h: (b, 0, h, 0)),
        compiler_params=pltpu.CompilerParams(
            dimension_semantics=("parallel", "parallel"),
            vmem_limit_bytes=_vmem_limit_bytes()),
    )(qkv, qkv, qkv)


# ------------------------------ CLIP logits -----------------------------------

def _clip_logits_kernel(img_ref, txt_ref, s_ref, o_ref):
    img = img_ref[...].astype(jnp.float32)
    txt = txt_ref[...].astype(jnp.float32)
    img = img * lax.rsqrt(jnp.sum(img * img, axis=-1, keepdims=True) + 1e-12)
    txt = txt * lax.rsqrt(jnp.sum(txt * txt, axis=-1, keepdims=True) + 1e-12)
    scale = jnp.exp(s_ref[...])                       # logit_scale.exp()
    logits = lax.dot_general(img, txt, (((1,), (1,)), ((), ())),
                             preferred_element_type=jnp.float32)
    o_ref[...] = (logits * scale).astype(o_ref.dtype)


def pallas_clip_logits(img_feat, txt_feat, logit_scale):
    B, D = img_feat.shape
    Bt = txt_feat.shape[0]
    s = logit_scale.reshape(1, 1).astype(jnp.float32)
    logits_per_image = pl.pallas_call(
        _clip_logits_kernel,
        out_shape=jax.ShapeDtypeStruct((B, Bt), jnp.float32),
        in_specs=[pl.BlockSpec((B, D), lambda: (0, 0)),
                  pl.BlockSpec((Bt, D), lambda: (0, 0)),
                  pl.BlockSpec((1, 1), lambda: (0, 0))],
        out_specs=pl.BlockSpec((B, Bt), lambda: (0, 0)),
        compiler_params=pltpu.CompilerParams(
            vmem_limit_bytes=_vmem_limit_bytes()),
    )(img_feat, txt_feat, s)
    return logits_per_image, logits_per_image.T       # transpose in plain JAX


# --------------------------- Transformer blocks -------------------------------

def residual_block(x, p, heads, causal):
    """Pre-LN residual attention block (CLIP style).  x: [B, S, W] bf16."""
    B, S, W = x.shape
    Dh = W // heads
    x2 = x.reshape(B * S, W)

    # ---- attention branch: LN fused into QKV, residual fused into out_proj ----
    qkv = pallas_linear(x2, p["in_proj_w"], p["in_proj_b"],
                        ln=(p["ln_1_g"], p["ln_1_b"]))               # [B*S, 3W]
    qkv = qkv.reshape(B, S, 3, heads, Dh)                            # free reshape
    a = pallas_attention(qkv, causal=causal)                         # [B, S, H, Dh]
    a = a.reshape(B * S, W)                                          # free reshape
    x2 = pallas_linear(a, p["out_proj_w"], p["out_proj_b"], residual=x2)

    # ---- MLP branch: LN fused into c_fc, residual fused into c_proj ----
    h = pallas_linear(x2, p["c_fc_w"], p["c_fc_b"],
                      ln=(p["ln_2_g"], p["ln_2_b"]), activation="quick_gelu")
    x2 = pallas_linear(h, p["c_proj_w"], p["c_proj_b"], residual=x2)
    return x2.reshape(B, S, W)


def encode_image(image, vp, cfg):
    """image: NCHW [B, 3, R, R] fp32 -> image features [B, embed_dim] bf16."""
    B, C, R, _ = image.shape
    P = cfg["vision_patch_size"]
    Wv = cfg["vision_width"]
    g = R // P

    # Conv2d(kernel=stride=P, no bias) == patch extraction + matmul (bf16 on MXU).
    patches = image.reshape(B, C, g, P, g, P).transpose(0, 2, 4, 1, 3, 5)
    patches = patches.reshape(B * g * g, C * P * P).astype(jnp.bfloat16)
    x = pallas_linear(patches, vp["conv1_w"]).reshape(B, g * g, Wv)

    cls = jnp.broadcast_to(vp["class_embedding"].reshape(1, 1, Wv), (B, 1, Wv))
    x = jnp.concatenate([cls, x], axis=1)                             # [B, S, Wv]
    S = x.shape[1]

    # ln_pre with the positional-embedding add fused into the same kernel.
    x = pallas_layernorm_add(x, vp["positional_embedding"],
                             vp["ln_pre_g"], vp["ln_pre_b"])
    for blk in vp["blocks"]:
        x = residual_block(x, blk, cfg["vision_heads"], causal=False)

    # ln_post fused into the output projection (cls token only).
    return pallas_linear(x[:, 0, :], vp["proj"],
                         ln=(vp["ln_post_g"], vp["ln_post_b"]))       # [B, embed_dim]


def encode_text(text, tp, cfg):
    """text: int token ids [B, L] -> text features [B, embed_dim] bf16."""
    B, L = text.shape
    # TODO(synk): embedding gather kept as plain-JAX glue (no clean Pallas win).
    x = tp["token_embedding"][text]
    x = x + tp["positional_embedding"][None]

    for blk in tp["blocks"]:
        x = residual_block(x, blk, cfg["transformer_heads"], causal=True)

    # Select EOT tokens first (LayerNorm commutes with the row select), then
    # apply ln_final fused into the text projection.
    eot = jnp.argmax(text, axis=-1)
    x_eot = x[jnp.arange(B), eot]                   # [B, W]
    return pallas_linear(x_eot, tp["text_projection"],
                         ln=(tp["ln_final_g"], tp["ln_final_b"]))     # [B, embed_dim]


def clip_forward(image, text, params, cfg):
    img_feat = encode_image(image, params["visual"], cfg)
    txt_feat = encode_text(text, params["text"], cfg)
    return pallas_clip_logits(img_feat, txt_feat, params["logit_scale"])


# ------------------------------- parameters -----------------------------------

def init_params(key, cfg):
    keys = iter(jax.random.split(key, 512))

    def nrm(shape, std, dtype=jnp.bfloat16):
        return (jax.random.normal(next(keys), shape, jnp.float32) * std).astype(dtype)

    def make_block(width, attn_std, proj_std, fc_std):
        # Weights generated in PyTorch [out, in] layout, transposed ONCE here
        # and stored in bf16 (MXU operand dtype); LN params stay fp32.
        return dict(
            ln_1_g=jnp.ones((width,), jnp.float32),
            ln_1_b=jnp.zeros((width,), jnp.float32),
            in_proj_w=nrm((3 * width, width), attn_std).T,      # [W, 3W]
            in_proj_b=jnp.zeros((3 * width,), jnp.bfloat16),
            out_proj_w=nrm((width, width), proj_std).T,         # [W, W]
            out_proj_b=jnp.zeros((width,), jnp.bfloat16),
            ln_2_g=jnp.ones((width,), jnp.float32),
            ln_2_b=jnp.zeros((width,), jnp.float32),
            c_fc_w=nrm((4 * width, width), fc_std).T,           # [W, 4W]
            c_fc_b=jnp.zeros((4 * width,), jnp.bfloat16),
            c_proj_w=nrm((width, 4 * width), proj_std).T,       # [4W, W]
            c_proj_b=jnp.zeros((width,), jnp.bfloat16),
        )

    # ----- text tower -----
    Wt, Lt, D = cfg["transformer_width"], cfg["transformer_layers"], cfg["embed_dim"]
    t_proj_std = Wt ** -0.5 * (2 * Lt) ** -0.5
    t_attn_std = Wt ** -0.5
    t_fc_std = (2 * Wt) ** -0.5
    text = dict(
        token_embedding=nrm((cfg["vocab_size"], Wt), 0.02),
        positional_embedding=nrm((cfg["context_length"], Wt), 0.01),
        blocks=[make_block(Wt, t_attn_std, t_proj_std, t_fc_std) for _ in range(Lt)],
        ln_final_g=jnp.ones((Wt,), jnp.float32),
        ln_final_b=jnp.zeros((Wt,), jnp.float32),
        text_projection=nrm((Wt, D), Wt ** -0.5),
    )

    # ----- vision tower -----
    Wv, Lv, P = cfg["vision_width"], cfg["vision_layers"], cfg["vision_patch_size"]
    grid = cfg["image_resolution"] // P
    v_scale = Wv ** -0.5
    v_proj_std = Wv ** -0.5 * (2 * Lv) ** -0.5
    v_attn_std = Wv ** -0.5
    v_fc_std = (2 * Wv) ** -0.5
    visual = dict(
        conv1_w=nrm((Wv, 3, P, P), 0.02, jnp.float32)
                .reshape(Wv, 3 * P * P).T.astype(jnp.bfloat16),       # [C*P*P, Wv]
        class_embedding=nrm((Wv,), v_scale),
        positional_embedding=nrm((grid * grid + 1, Wv), v_scale),
        ln_pre_g=jnp.ones((Wv,), jnp.float32),
        ln_pre_b=jnp.zeros((Wv,), jnp.float32),
        blocks=[make_block(Wv, v_attn_std, v_proj_std, v_fc_std) for _ in range(Lv)],
        ln_post_g=jnp.ones((Wv,), jnp.float32),
        ln_post_b=jnp.zeros((Wv,), jnp.float32),
        proj=nrm((Wv, D), v_scale),
    )

    return dict(
        visual=visual,
        text=text,
        logit_scale=jnp.array(math.log(1.0 / 0.07), jnp.float32),
    )


# ---------------------------------- main --------------------------------------

if __name__ == "__main__":
    cfg = dict(
        embed_dim=32,
        image_resolution=16,
        vision_layers=2,
        vision_width=64,
        vision_patch_size=8,
        context_length=8,
        vocab_size=64,
        transformer_width=32,
        transformer_heads=4,
        transformer_layers=2,
        # deep_prompt_len / total_d_layer_len are stored but unused in forward()
    )
    cfg["vision_heads"] = cfg["vision_width"] // 64  # = 1

    key = jax.random.PRNGKey(0)
    k_params, k_img, k_txt = jax.random.split(key, 3)

    params = init_params(k_params, cfg)

    B = 2
    image = jax.random.normal(
        k_img, (B, 3, cfg["image_resolution"], cfg["image_resolution"]), jnp.float32)
    text = jax.random.randint(
        k_txt, (B, cfg["context_length"]), 1, cfg["vocab_size"] - 1, dtype=jnp.int32)
    text = text.at[:, -1].set(cfg["vocab_size"] - 1)  # EOT token (highest id -> argmax)

    logits_per_image, logits_per_text = clip_forward(image, text, params, cfg)
    jax.block_until_ready((logits_per_image, logits_per_text))

    assert logits_per_image.shape == (B, B) and logits_per_text.shape == (B, B)
    assert bool(jnp.all(jnp.isfinite(logits_per_image)))
    print("KERNEL_OK")
</pallas_src>

<mosaic_0001>
module attributes {stable_mosaic.version = 11 : i64} {
  func.func @_linear_kernel(%arg0: i32, %arg1: i32, %arg2: i32, %arg3: memref<8x192xbf16, #tpu.memory_space<vmem>>, %arg4: memref<192x64xbf16, #tpu.memory_space<vmem>>, %arg5: memref<1x64xbf16, #tpu.memory_space<vmem>>, %arg6: memref<8x64xbf16, #tpu.memory_space<vmem>>, %arg7: memref<8x64xf32, #tpu.memory_space<vmem>>) attributes {dimension_semantics = [#tpu.dimension_semantics<parallel>, #tpu.dimension_semantics<parallel>, #tpu.dimension_semantics<arbitrary>], iteration_bounds = array<i64: 1, 1, 1>, scalar_prefetch = 0 : i64, scratch_operands = 1 : i64, tpu.core_type = #tpu.core_type<tc>, window_params = [{transform_indices = @transform_0, window_bounds = array<i64: 8, 192>}, {transform_indices = @transform_1, window_bounds = array<i64: 192, 64>}, {transform_indices = @transform_2, window_bounds = array<i64: 1, 64>}, {transform_indices = @transform_3, window_bounds = array<i64: 8, 64>}]} {
    %c0_i32 = arith.constant 0 : i32
    %0 = arith.cmpi eq, %arg2, %c0_i32 : i32
    %1 = arith.extui %0 : i1 to i32
    %c0_i32_0 = arith.constant 0 : i32
    %2 = arith.cmpi ne, %1, %c0_i32_0 : i32
    scf.if %2 {
      %cst_10 = arith.constant 0.000000e+00 : f32
      %12 = vector.broadcast %cst_10 : f32 to vector<8x64xf32>
      %c0_11 = arith.constant 0 : index
      %c0_12 = arith.constant 0 : index
      %13 = vector.load %arg7[%c0_11, %c0_12] : memref<8x64xf32, #tpu.memory_space<vmem>>, vector<8x64xf32>
      tpu.vector_store %arg7[%c0_11, %c0_12], %12 {strides = array<i32>} : memref<8x64xf32, #tpu.memory_space<vmem>>, vector<8x64xf32>,
    } else {
    }
    %c0 = arith.constant 0 : index
    %c0_1 = arith.constant 0 : index
    %3 = vector.load %arg3[%c0, %c0_1] : memref<8x192xbf16, #tpu.memory_space<vmem>>, vector<8x192xbf16>
    %c0_2 = arith.constant 0 : index
    %c0_3 = arith.constant 0 : index
    %4 = vector.load %arg7[%c0_2, %c0_3] : memref<8x64xf32, #tpu.memory_space<vmem>>, vector<8x64xf32>
    %c0_4 = arith.constant 0 : index
    %c0_5 = arith.constant 0 : index
    %5 = vector.load %arg4[%c0_4, %c0_5] : memref<192x64xbf16, #tpu.memory_space<vmem>>, vector<192x64xbf16>
    %cst = arith.constant dense<0.000000e+00> : vector<8x64xf32>
    %6 = tpu.matmul %3, %5, %cst {dimension_numbers = #tpu.dot_dimension_numbers<[1], [0], [0], [1], [0, 0, 1, 1], [], []>} : vector<8x192xbf16>, vector<192x64xbf16>, vector<8x64xf32> -> vector<8x64xf32>
    %7 = arith.addf %4, %6 : vector<8x64xf32>
    %c0_6 = arith.constant 0 : index
    %c0_7 = arith.constant 0 : index
    %8 = vector.load %arg7[%c0_6, %c0_7] : memref<8x64xf32, #tpu.memory_space<vmem>>, vector<8x64xf32>
    tpu.vector_store %arg7[%c0_6, %c0_7], %7 {strides = array<i32>} : memref<8x64xf32, #tpu.memory_space<vmem>>, vector<8x64xf32>,
    %c0_i32_8 = arith.constant 0 : i32
    %9 = arith.cmpi eq, %arg2, %c0_i32_8 : i32
    %10 = arith.extui %9 : i1 to i32
    %c0_i32_9 = arith.constant 0 : i32
    %11 = arith.cmpi ne, %10, %c0_i32_9 : i32
    scf.if %11 {
      %c0_10 = arith.constant 0 : index
      %c0_11 = arith.constant 0 : index
      %12 = vector.load %arg7[%c0_10, %c0_11] : memref<8x64xf32, #tpu.memory_space<vmem>>, vector<8x64xf32>
      %c0_12 = arith.constant 0 : index
      %c0_13 = arith.constant 0 : index
      %13 = vector.load %arg5[%c0_12, %c0_13] : memref<1x64xbf16, #tpu.memory_space<vmem>>, vector<1x64xbf16>
      %14 = arith.extf %13 : vector<1x64xbf16> to vector<1x64xf32>
      %15 = vector.broadcast %14 : vector<1x64xf32> to vector<8x64xf32>
      %16 = arith.addf %12, %15 : vector<8x64xf32>
      %17 = arith.truncf %16 : vector<8x64xf32> to vector<8x64xbf16>
      %c0_14 = arith.constant 0 : index
      %c0_15 = arith.constant 0 : index
      %18 = vector.load %arg6[%c0_14, %c0_15] : memref<8x64xbf16, #tpu.memory_space<vmem>>, vector<8x64xbf16>
      tpu.vector_store %arg6[%c0_14, %c0_15], %17 {strides = array<i32>} : memref<8x64xbf16, #tpu.memory_space<vmem>>, vector<8x64xbf16>,
    } else {
    }
    return
  }
  func.func @transform_0(%arg0: i32, %arg1: i32, %arg2: i32) -> (i32, i32) {
    %c0_i32 = arith.constant 0 : i32
    return %arg0, %arg2 : i32, i32
  }
  func.func @transform_1(%arg0: i32, %arg1: i32, %arg2: i32) -> (i32, i32) {
    %c0_i32 = arith.constant 0 : i32
    return %arg2, %arg1 : i32, i32
  }
  func.func @transform_2(%arg0: i32, %arg1: i32, %arg2: i32) -> (i32, i32) {
    %c0_i32 = arith.constant 0 : i32
    %c0_i32_0 = arith.constant 0 : i32
    return %c0_i32, %arg1 : i32, i32
  }
  func.func @transform_3(%arg0: i32, %arg1: i32, %arg2: i32) -> (i32, i32) {
    %c0_i32 = arith.constant 0 : i32
    return %arg0, %arg1 : i32, i32
  }
}

</mosaic_0001>

<bundles_post_ra>
// kernel: tpu_custom_call.1
= control target key start
LH: loop header
LB: loop body
LE: loop exit
PB: predicated region body
PF: predicated region fallthrough
CT: control target
= control target key end

     0   :  { %v256_v1 = vmov 0   ;;  %vm20_vm0 = vcmask 523264   ;;  %v257_v3 = vmov 0.0   ;;  %s336_s0 = inlined_call_operand.vmem [shape: bf16[8,192], index: 0, kind: input, shape index: {}]   ;;  %s337_s1 = inlined_call_operand.vmem [shape: bf16[192,64], index: 1, kind: input, shape index: {}]   ;;  %s338_s2 = inlined_call_operand.vmem [shape: bf16[1,64], index: 2, kind: input, shape index: {}]   ;;  %s339_s3 = inlined_call_operand.hbm [shape: bf16[8,64], index: 3, kind: output, shape index: {}]  }
   0x1   :  { %v218_v0 = vld [vmem:[%s337_s1] sm:$0xff]   ;;  %130 = vmatprep.subr.bf16.mxu0 %v256_v1  ;;  %v219_v2 = vld [vmem:[%s337_s1 + $0x8] sm:$0xff]   ;;  %21 = vst.msk [vmem:[#allocation2] sm:$0xff] %vm20_vm0, %v257_v3  ;;  %v220_v4 = vld [vmem:[%s337_s1 + $0x10] sm:$0xff]  }
   0x2   :  { %131 = vmatpush1.bf16.msra.mxu0 %v218_v0  ;;  %v221_v5 = vld [vmem:[%s337_s1 + $0x18] sm:$0xff]   ;;  %v22_v6 = vld [vmem:[%s336_s0] sm:$0xff] }
   0x3   :  { %132 = vmatprep.subr.bf16.mxu0 %v256_v1 }
   0x6   :  { %133 = vmatpush1.bf16.msra.mxu0 %v219_v2 }
   0x7   :  { %134 = vmatprep.subr.bf16.mxu0 %v256_v1 }
   0xa   :  { %135 = vmatpush1.bf16.msra.mxu0 %v220_v4 }
   0xb   :  { %136 = vmatprep.subr.bf16.mxu0 %v256_v1 }
   0xc   :  { %8 = vsyncpa [#allocation4], 0  ;;  %v201_v7 = vcombine.high %v22_v6, %v22_v6  ;;  %v222_v8 = vld [vmem:[%s337_s1 + $0x20] sm:$0xff]   ;;  %v223_v9 = vld [vmem:[%s337_s1 + $0x28] sm:$0xff]   ;;  %v200_v16 = vcombine.low %v22_v6, %v22_v6  ;;  %v178_v17 = vlaneseq  ;;  %vm184_vm1 = vcmask 519168  }
   0xd   :  { %v224_v10 = vld [vmem:[%s337_s1 + $0x30] sm:$0xff]   ;;  %v225_v11 = vld [vmem:[%s337_s1 + $0x38] sm:$0xff]   ;;  %v226_v12 = vld [vmem:[%s337_s1 + $0x40] sm:$0xff]  }
   0xe   :  { %137 = vmatpush1.bf16.msra.mxu0 %v221_v5  ;;  %214 = vmatprep.mubr.msk.bf16.mxu0 %vm20_vm0, %v201_v7  ;;  %v227_v13 = vld [vmem:[%s337_s1 + $0x48] sm:$0xff]   ;;  %v228_v14 = vld [vmem:[%s337_s1 + $0x50] sm:$0xff]   ;;  %v229_v15 = vld [vmem:[%s337_s1 + $0x58] sm:$0xff]   ;;  %v179_v19 = vshrl.u32 %v178_v17, 7  ;;  %s258_s1 = smov [#allocation3]  }
   0xf   :  { %138 = vmatprep.subr.bf16.mxu0 %v256_v1  ;;  %v23_v18 = vld [vmem:[#allocation2] sm:$0xff]  ;;  %s192_s12 = sshll.u32 %s258_s1, 4  ;;  %s193_s12 = int_to_ptr.vmem [resolvable:$true] %s192_s12 }
  0x10   :  { %v176_v21 = vld [vmem:[%s338_s2] sm:$0x1]  ;;  %v180_v27 = vsub.s32 0, %v179_v19  ;;  %s232_s13 = scalar_lea.vmem %s193_s12, 64  ;;  %p237_p1 = scmp.lt.s32.totalorder %s193_s12, %s193_s12 }
  0x11   :  { %v177_v26 = vunpack.c.l.bf16 %v176_v21  ;;  %p233_p0 = scmp.ne.s32.totalorder %s193_s12, %s232_s13  ;;  %p238_p2 = scmp.lt.s32.totalorder %s232_s13, %s232_s13 }
  0x12   :  { %139 = vmatpush1.bf16.msra.mxu0 %v222_v8 }
  0x13   :  { %140 = vmatprep.subr.bf16.mxu0 %v256_v1  ;;  %v181_v28 = vrot.slane %v177_v26, %v180_v27  ;;  %p239_p3 = por %p238_p2, %p237_p1 }
  0x15   :  { %p240_p4 = pnand %p239_p3, %p233_p0 }
  0x16   :  { %141 = vmatpush1.bf16.msra.mxu0 %v223_v9 }
  0x17   :  { %142 = vmatprep.subr.bf16.mxu0 %v256_v1 }
  0x1a   :  { %143 = vmatpush1.bf16.msra.mxu0 %v224_v10 }
  0x1b   :  { %144 = vmatprep.subr.bf16.mxu0 %v256_v1 }
  0x1e   :  { %145 = vmatpush1.bf16.msra.mxu0 %v225_v11 }
  0x1f   :  { %146 = vmatprep.subr.bf16.mxu0 %v256_v1 }
  0x22   :  { %147 = vmatpush1.bf16.msra.mxu0 %v226_v12 }
  0x23   :  { %148 = vmatprep.subr.bf16.mxu0 %v256_v1 }
  0x26   :  { %149 = vmatpush1.bf16.msra.mxu0 %v227_v13 }
  0x27   :  { %150 = vmatprep.subr.bf16.mxu0 %v256_v1 }
  0x2a   :  { %151 = vmatpush1.bf16.msra.mxu0 %v228_v14 }
  0x2b   :  { %152 = vmatprep.subr.bf16.mxu0 %v256_v1 }
  0x2e   :  { %153 = vmatpush1.bf16.msra.mxu0 %v229_v15 }
  0x31   :  { %163 = vmatmul.mubr.bf16.vlgmr.msra.gmra.mrb[0].mxu0 %v200_v16 }
 0x104   :  { %v164_v20 = vpop.f32.mrb[0].mxu0 }
 0x105   :  { %v170_v22 = vadd.f32 %v164_v20, %v23_v18  ;;  %v166_v23 = vpop.f32.mrb[1].mxu0 }
 0x106   :  { %v167_v24 = vpop.f32.mrb[2].mxu0 }
 0x107   :  { %171 = vst.msk [vmem:[#allocation2] sm:$0xff] %vm20_vm0, %v170_v22  ;;  %v168_v25 = vpop.f32.mrb[3].mxu0 }
 0x10e   :  { %v175_v29 = vld [vmem:[#allocation2] sm:$0xff] }
 0x10f   :  { %v182_v30 = vadd.f32 %v181_v28, %v175_v29 }
 0x111   :  { %v183_v31 = vpack.c.bf16 %v182_v30, %v182_v30 }
 0x113   :  { %185 = vst.msk [vmem:[#allocation3] sm:$0xf] %vm184_vm1, %v183_v31 }
 0x114   :  { %243 = shalt.err (!%p240_p4)
}
 0x115   :  { %s244_s15 = scalar_lea.hbm %s339_s3, 64 }
 0x116   :  { %p245_p5 = scmp.ne.s32.totalorder %s339_s3, %s244_s15  ;;  %p248_p6 = scmp.lt.u32.totalorder %s244_s15, %s339_s3 }
 0x118   :  { %p250_p7 = pnand %p248_p6, %p245_p5 }
 0x11a   :  { %253 = shalt.err (!%p250_p7)
}
 0x11b   :  { %195 = dma.vmem_to_hbm [thread:$0]  %s193_s12, 64, %s339_s3, [#allocation4]  }
 0x11c   :  { %254 = dma.done.wait [#allocation4], 64  }
 0x11d   :  { %255 = vsyncadd [#allocation4], 4294967232 }
 0x11e   :  { %199 = vsyncpa [#allocation4], 1 }

</bundles_post_ra>
